<compile_context>
chip_gen: v5e
topology: v5e:2x2
jax: 0.10.0
libtpu: 0.0.40
codegen_flags: <defaults>
</compile_context>

<pallas_src>
import jax
import jax.numpy as jnp
from jax.experimental import pallas as pl
from jax.experimental.pallas import tpu as pltpu


def _round_up(x, m):
    return ((x + m - 1) // m) * m


# ---------------------------------------------------------------------------
# Kernel
# ---------------------------------------------------------------------------
def dgm_lstm_kernel(s_ref, x_ref, ucat_ref, wcat_ref, wh_ref, out_ref):
    odp = out_ref.shape[1]
    mm_dtype = ucat_ref.dtype            # f32 or bf16 (matmul-operand dtype)

    S = s_ref[...]                       # (Bp, odp)  f32 state (also output)
    S_mm = S.astype(mm_dtype)

    # Fused pre-activations.  Biases ride along inside Ucat (X has a 1-column),
    # so pre_u already contains input + bias terms for all four gates:
    #   pre_u[:, 0:od]->Z  [od:2od]->G  [2od:3od]->R  [3od:4od]->H
    # pre_w holds only the Z/G/R recurrent terms (H's recurrent term depends
    # on R, so it is a separate small matmul below).
    pre_u = jnp.dot(x_ref[...], ucat_ref[...],
                    preferred_element_type=jnp.float32)      # (Bp, 4*odp)
    pre_w = jnp.dot(S_mm, wcat_ref[...],
                    preferred_element_type=jnp.float32)      # (Bp, 3*odp)

    Z = jnp.tanh(pre_u[:, 0 * odp:1 * odp] + pre_w[:, 0 * odp:1 * odp])
    G = jnp.tanh(pre_u[:, 1 * odp:2 * odp] + pre_w[:, 1 * odp:2 * odp])
    R = jnp.tanh(pre_u[:, 2 * odp:3 * odp] + pre_w[:, 2 * odp:3 * odp])
    H = jnp.tanh(pre_u[:, 3 * odp:4 * odp]
                 + jnp.dot((S * R).astype(mm_dtype), wh_ref[...],
                           preferred_element_type=jnp.float32))

    out_ref[...] = ((1.0 - G) * H + Z * S).astype(out_ref.dtype)


# ---------------------------------------------------------------------------
# One-time parameter preparation (hoisted out of the step function)
# ---------------------------------------------------------------------------
def prepare_params(params, matmul_dtype=jnp.float32):
    """Fuse + pad the 12 DGM_LSTM parameters into 3 lane-dense VMEM slabs.

    Call once; reuse the result for every forward step.
      ucat : (idp, 4*odp)  [uz|ug|ur|uh] with biases in row `in_dim`
      wcat : (odp, 3*odp)  [wz|wg|wr]    (no zero H block)
      wh   : (odp, odp)
    """
    in_dim, out_dim = params["uz"].shape
    idp = _round_up(in_dim + 1, 128)     # +1 column carries the bias ride-along
    odp = _round_up(out_dim, 128)
    f32 = jnp.float32

    def u_block(u, b):
        blk = jnp.zeros((idp, odp), f32)
        blk = blk.at[:in_dim, :out_dim].set(u.astype(f32))
        blk = blk.at[in_dim, :out_dim].set(b.astype(f32).reshape(-1))
        return blk

    def pad2(w, rows, cols):
        w = w.astype(f32)
        return jnp.pad(w, ((0, rows - w.shape[0]), (0, cols - w.shape[1])))

    ucat = jnp.concatenate(
        [u_block(params["uz"], params["bz"]),
         u_block(params["ug"], params["bg"]),
         u_block(params["ur"], params["br"]),
         u_block(params["uh"], params["bh"])], axis=1).astype(matmul_dtype)
    wcat = jnp.concatenate(
        [pad2(params["wz"], odp, odp),
         pad2(params["wg"], odp, odp),
         pad2(params["wr"], odp, odp)], axis=1).astype(matmul_dtype)
    wh = pad2(params["wh"], odp, odp).astype(matmul_dtype)

    return {"ucat": ucat, "wcat": wcat, "wh": wh,
            "in_dim": in_dim, "out_dim": out_dim}


# ---------------------------------------------------------------------------
# Per-step forward
# ---------------------------------------------------------------------------
@jax.jit
def dgm_lstm_forward(S, X, prepared):
    B, out_dim = S.shape
    in_dim = X.shape[1]

    ucat, wcat, wh = prepared["ucat"], prepared["wcat"], prepared["wh"]
    idp = ucat.shape[0]
    odp = wh.shape[0]
    mm_dtype = ucat.dtype
    mm_itemsize = jnp.dtype(mm_dtype).itemsize
    Bp = _round_up(B, 8)
    f32 = jnp.float32

    # Pad state / input (only per-step padding that remains; it is tiny).
    # S_p is created here inside the jit, so aliasing it to the output never
    # clobbers the caller's buffer.
    S_p = jnp.pad(S.astype(f32), ((0, Bp - B), (0, odp - out_dim)))
    X_p = jnp.pad(X.astype(f32), ((0, Bp - B), (0, idp - in_dim)))
    X_p = X_p.at[:, in_dim].set(1.0)          # bias ride-along column
    X_p = X_p.astype(mm_dtype)

    operands = (S_p, X_p, ucat, wcat, wh)

    # Advisory cost estimate for XLA's scheduler.
    flops = (2 * Bp * idp * 4 * odp           # X @ Ucat
             + 2 * Bp * odp * 3 * odp         # S @ Wcat
             + 2 * Bp * odp * odp             # (S*R) @ wh
             + 12 * Bp * odp)                 # gate adds + blend
    transcendentals = 4 * Bp * odp
    bytes_accessed = (4 * 2 * Bp * odp                     # S in + out (f32)
                      + mm_itemsize * (Bp * idp            # X
                                       + idp * 4 * odp     # ucat
                                       + odp * 3 * odp     # wcat
                                       + odp * odp))       # wh

    # VMEM budget guard (v7x has only 64 MiB physical; 16/32 MiB default
    # scoped limits on v5e/v6e).  Raise the limit once slabs get real-sized.
    vmem_needed = (mm_itemsize * (idp * 4 * odp + odp * 3 * odp + odp * odp
                                  + Bp * idp)
                   + 4 * Bp * (2 * odp + 7 * odp))          # S/out + pre_u/pre_w
    compiler_params = None
    if vmem_needed > (12 << 20):
        compiler_params = pltpu.CompilerParams(
            vmem_limit_bytes=min(int(2 * vmem_needed), 100 << 20))
        # NOTE: past ~half of physical VMEM a gate-N grid (512-lane blocks)
        # is required instead; not needed at the shapes exercised here.

    in_specs = [pl.BlockSpec(memory_space=pltpu.MemorySpace.VMEM)
                for _ in operands]
    out_spec = pl.BlockSpec(memory_space=pltpu.MemorySpace.VMEM)

    out_p = pl.pallas_call(
        dgm_lstm_kernel,
        out_shape=jax.ShapeDtypeStruct((Bp, odp), f32),
        in_specs=in_specs,
        out_specs=out_spec,
        input_output_aliases={0: 0},          # new state overwrites S_p's buffer
        compiler_params=compiler_params,
        cost_estimate=pl.CostEstimate(
            flops=flops,
            transcendentals=transcendentals,
            bytes_accessed=bytes_accessed),
    )(*operands)

    return out_p[:B, :out_dim].astype(S.dtype)


# ---------------------------------------------------------------------------
# Reference + init
# ---------------------------------------------------------------------------
def init_params(key, in_dim, out_dim, dtype=jnp.float32):
    # Deterministic synthetic init (PyTorch's .random_() draws are not
    # reproduced — only shapes/structure matter here).
    ks = jax.random.split(key, 8)
    return {
        "uz": jax.random.normal(ks[0], (in_dim, out_dim), dtype),
        "ug": jax.random.normal(ks[1], (in_dim, out_dim), dtype),
        "ur": jax.random.normal(ks[2], (in_dim, out_dim), dtype),
        "uh": jax.random.normal(ks[3], (in_dim, out_dim), dtype),
        "wz": jax.random.normal(ks[4], (out_dim, out_dim), dtype),
        "wg": jax.random.normal(ks[5], (out_dim, out_dim), dtype),
        "wr": jax.random.normal(ks[6], (out_dim, out_dim), dtype),
        "wh": jax.random.normal(ks[7], (out_dim, out_dim), dtype),
        "bz": jnp.ones((1, out_dim), dtype),
        "bg": jnp.ones((1, out_dim), dtype),
        "br": jnp.ones((1, out_dim), dtype),
        "bh": jnp.ones((1, out_dim), dtype),
    }


def reference_forward(S, X, p):
    act = jnp.tanh
    Z = act(X @ p["uz"] + S @ p["wz"] + p["bz"])
    G = act(X @ p["ug"] + S @ p["wg"] + p["bg"])
    R = act(X @ p["ur"] + S @ p["wr"] + p["br"])
    H = act(X @ p["uh"] + (S * R) @ p["wh"] + p["bh"])
    return (1.0 - G) * H + Z * S


if __name__ == "__main__":
    B, in_dim, out_dim = 8, 16, 32
    key = jax.random.PRNGKey(0)
    k_s, k_x, k_p = jax.random.split(key, 3)

    S = jax.random.normal(k_s, (B, out_dim), jnp.float32)
    X = jax.random.normal(k_x, (B, in_dim), jnp.float32)
    params = init_params(k_p, in_dim, out_dim)
    ref = reference_forward(S, X, params)

    # --- f32 matmul operands: exact semantics of the PyTorch module --------
    prepared_f32 = prepare_params(params, matmul_dtype=jnp.float32)
    out = jax.block_until_ready(dgm_lstm_forward(S, X, prepared_f32))
    assert out.shape == (B, out_dim), out.shape
    assert jnp.allclose(out, ref, atol=1e-5, rtol=1e-5), (
        float(jnp.max(jnp.abs(out - ref))))

    # --- bf16 matmul operands (perf path for real shapes): f32 accumulation,
    # f32 tanh/blend; only sanity-checked against the f32 reference. ---------
    prepared_bf16 = prepare_params(params, matmul_dtype=jnp.bfloat16)
    out_bf16 = jax.block_until_ready(dgm_lstm_forward(S, X, prepared_bf16))
    assert out_bf16.shape == (B, out_dim), out_bf16.shape
    assert float(jnp.max(jnp.abs(out_bf16 - ref))) < 0.35, (
        float(jnp.max(jnp.abs(out_bf16 - ref))))

    print("KERNEL_OK")
</pallas_src>

<mosaic_0001>
module attributes {stable_mosaic.version = 11 : i64} {
  func.func @dgm_lstm_kernel(%arg0: memref<8x128xf32, #tpu.memory_space<vmem>>, %arg1: memref<8x128xf32, #tpu.memory_space<vmem>>, %arg2: memref<128x512xf32, #tpu.memory_space<vmem>>, %arg3: memref<128x384xf32, #tpu.memory_space<vmem>>, %arg4: memref<128x128xf32, #tpu.memory_space<vmem>>, %arg5: memref<8x128xf32, #tpu.memory_space<vmem>>) attributes {dimension_semantics = [], scalar_prefetch = 0 : i64, scratch_operands = 0 : i64, tpu.core_type = #tpu.core_type<tc>} {
    %c0 = arith.constant 0 : index
    %c0_0 = arith.constant 0 : index
    %0 = vector.load %arg0[%c0, %c0_0] : memref<8x128xf32, #tpu.memory_space<vmem>>, vector<8x128xf32>
    %c0_1 = arith.constant 0 : index
    %c0_2 = arith.constant 0 : index
    %1 = vector.load %arg1[%c0_1, %c0_2] : memref<8x128xf32, #tpu.memory_space<vmem>>, vector<8x128xf32>
    %c0_3 = arith.constant 0 : index
    %c0_4 = arith.constant 0 : index
    %2 = vector.load %arg2[%c0_3, %c0_4] : memref<128x512xf32, #tpu.memory_space<vmem>>, vector<128x512xf32>
    %cst = arith.constant dense<0.000000e+00> : vector<8x512xf32>
    %3 = tpu.matmul %1, %2, %cst {dimension_numbers = #tpu.dot_dimension_numbers<[1], [0], [0], [1], [0, 0, 1, 1], [], []>} : vector<8x128xf32>, vector<128x512xf32>, vector<8x512xf32> -> vector<8x512xf32>
    %c0_5 = arith.constant 0 : index
    %c0_6 = arith.constant 0 : index
    %4 = vector.load %arg3[%c0_5, %c0_6] : memref<128x384xf32, #tpu.memory_space<vmem>>, vector<128x384xf32>
    %cst_7 = arith.constant dense<0.000000e+00> : vector<8x384xf32>
    %5 = tpu.matmul %0, %4, %cst_7 {dimension_numbers = #tpu.dot_dimension_numbers<[1], [0], [0], [1], [0, 0, 1, 1], [], []>} : vector<8x128xf32>, vector<128x384xf32>, vector<8x384xf32> -> vector<8x384xf32>
    %6 = vector.extract_strided_slice %3 {offsets = [0, 0], sizes = [8, 128], strides = [1, 1]} : vector<8x512xf32> to vector<8x128xf32>
    %7 = vector.extract_strided_slice %5 {offsets = [0, 0], sizes = [8, 128], strides = [1, 1]} : vector<8x384xf32> to vector<8x128xf32>
    %8 = arith.addf %6, %7 : vector<8x128xf32>
    %9 = math.tanh %8 : vector<8x128xf32>
    %10 = vector.extract_strided_slice %3 {offsets = [0, 128], sizes = [8, 128], strides = [1, 1]} : vector<8x512xf32> to vector<8x128xf32>
    %11 = vector.extract_strided_slice %5 {offsets = [0, 128], sizes = [8, 128], strides = [1, 1]} : vector<8x384xf32> to vector<8x128xf32>
    %12 = arith.addf %10, %11 : vector<8x128xf32>
    %13 = math.tanh %12 : vector<8x128xf32>
    %14 = vector.extract_strided_slice %3 {offsets = [0, 256], sizes = [8, 128], strides = [1, 1]} : vector<8x512xf32> to vector<8x128xf32>
    %15 = vector.extract_strided_slice %5 {offsets = [0, 256], sizes = [8, 128], strides = [1, 1]} : vector<8x384xf32> to vector<8x128xf32>
    %16 = arith.addf %14, %15 : vector<8x128xf32>
    %17 = math.tanh %16 : vector<8x128xf32>
    %18 = vector.extract_strided_slice %3 {offsets = [0, 384], sizes = [8, 128], strides = [1, 1]} : vector<8x512xf32> to vector<8x128xf32>
    %19 = arith.mulf %0, %17 : vector<8x128xf32>
    %c0_8 = arith.constant 0 : index
    %c0_9 = arith.constant 0 : index
    %20 = vector.load %arg4[%c0_8, %c0_9] : memref<128x128xf32, #tpu.memory_space<vmem>>, vector<128x128xf32>
    %cst_10 = arith.constant dense<0.000000e+00> : vector<8x128xf32>
    %21 = tpu.matmul %19, %20, %cst_10 {dimension_numbers = #tpu.dot_dimension_numbers<[1], [0], [0], [1], [0, 0, 1, 1], [], []>} : vector<8x128xf32>, vector<128x128xf32>, vector<8x128xf32> -> vector<8x128xf32>
    %22 = arith.addf %18, %21 : vector<8x128xf32>
    %23 = math.tanh %22 : vector<8x128xf32>
    %cst_11 = arith.constant 1.000000e+00 : f32
    %24 = vector.broadcast %cst_11 : f32 to vector<8x128xf32>
    %25 = arith.subf %24, %13 : vector<8x128xf32>
    %26 = arith.mulf %25, %23 : vector<8x128xf32>
    %27 = arith.mulf %9, %0 : vector<8x128xf32>
    %28 = arith.addf %26, %27 : vector<8x128xf32>
    %c0_12 = arith.constant 0 : index
    %c0_13 = arith.constant 0 : index
    %29 = vector.load %arg5[%c0_12, %c0_13] : memref<8x128xf32, #tpu.memory_space<vmem>>, vector<8x128xf32>
    tpu.vector_store %arg5[%c0_12, %c0_13], %28 {strides = array<i32>} : memref<8x128xf32, #tpu.memory_space<vmem>>, vector<8x128xf32>,
    return
  }
}

</mosaic_0001>

<bundles_post_ra>
// kernel: dgm_lstm_forward.1
= control target key start
LH: loop header
LB: loop body
LE: loop exit
PB: predicated region body
PF: predicated region fallthrough
CT: control target
= control target key end

     0   :  { %10 = vsyncpa [#allocation3], 0  ;;  %s540_s0 = inlined_call_operand.vmem [shape: f32[8,128], index: 0, kind: input, shape index: {}, may-alias: {0,5}]   ;;  %s541_s1 = inlined_call_operand.vmem [shape: f32[8,128], index: 1, kind: input, shape index: {}]   ;;  %s542_s2 = inlined_call_operand.hbm [shape: f32[128,512], index: 2, kind: input, shape index: {}]   ;;  %s543_s3 = inlined_call_operand.hbm [shape: f32[128,384], index: 3, kind: input, shape index: {}]   ;;  %s544_s4 = inlined_call_operand.hbm [shape: f32[128,128], index: 4, kind: input, shape index: {}]   ;;  %s545_s5 = inlined_call_operand.vmem [shape: f32[8,128], index: 5, kind: output, shape index: {}, may-alias: {0,5}]  }
   0x1   :  { %11 = vsyncpa [#allocation5], 0  ;;  %s33_s20 = sshll.u32 %s543_s3, 4  ;;  %s470_s21 = smov [#allocation4]   ;;  %s34_s20 = int_to_ptr.hbm [resolvable:$true] %s33_s20 }
   0x2   :  { %s35_s22 = sshll.u32 %s470_s21, 4  ;;  %s20_s25 = sshll.u32 %s542_s2, 4  ;;  %s36_s22 = int_to_ptr.vmem [resolvable:$true] %s35_s22  ;;  %s21_s25 = int_to_ptr.hbm [resolvable:$true] %s20_s25 }
   0x3   :  { %s471_s26 = smov 384   ;;  %s472_s27 = smov 24  }
   0x4   :  { %41 = dma.hbm_to_vmem [thread:$0]  %s34_s20, 6144, %s36_s22, [#allocation5], %s471_s26, %s471_s26, %s472_s27  }
   0x5   :  { %s473_s28 = smov [#allocation2]   ;;  %s474_s30 = smov 512  }
   0x6   :  { %s22_s29 = sshll.u32 %s473_s28, 4  ;;  %s475_s6 = smov 32   ;;  %s23_s29 = int_to_ptr.vmem [resolvable:$true] %s22_s29 }
   0x7   :  { %28 = dma.hbm_to_vmem [thread:$0]  %s21_s25, 8192, %s23_s29, [#allocation3], %s474_s30, %s474_s30, %s475_s6  }
   0x8   :  { %s46_s8 = sshll.u32 %s544_s4, 4  ;;  %s476_s9 = smov [#allocation6]   ;;  %s47_s8 = int_to_ptr.hbm [resolvable:$true] %s46_s8 }
   0x9   :  { %s48_s10 = sshll.u32 %s476_s9, 4  ;;  %s477_s11 = smov 128   ;;  %s49_s10 = int_to_ptr.vmem [resolvable:$true] %s48_s10 }
   0xa   :  { %s478_s2 = smov 8  }
   0xb   :  { %54 = dma.hbm_to_vmem [thread:$0]  %s47_s8, 2048, %s49_s10, [#allocation5], %s477_s11, %s477_s11, %s478_s2  }
   0xc   :  { %466 = dma.done.wait [#allocation3], 8192  }
   0xd   :  { %467 = vsyncadd [#allocation3], 4294959104 }
   0xe   :  { %468 = dma.done.wait [#allocation5], 8192  }
   0xf   :  { %469 = vsyncadd [#allocation5], 4294959104  ;;  %v131_v0 = vld [vmem:[#allocation2 + $0x1f0] sm:$0xff]  ;;  %v260_v16 = vld [vmem:[#allocation4 + $0x178] sm:$0xff] }
  0x10   :  { %v127_v1 = vld [vmem:[#allocation2 + $0x1d0] sm:$0xff]  ;;  %173 = vmatpush.msra.mxu2 %v131_v0  ;;  %v257_v17 = vld [vmem:[#allocation4 + $0x160] sm:$0xff]  ;;  %v130_v19 = vld [vmem:[#allocation2 + $0x1e8] sm:$0xff] }
  0x11   :  { %v123_v2 = vld [vmem:[#allocation2 + $0x1b0] sm:$0xff]  ;;  %v521_v18 = vld [vmem:[%s541_s1] sm:$0xff]  ;;  %v126_v21 = vld [vmem:[#allocation2 + $0x1c8] sm:$0xff]  ;;  %153 = vmatpush.msra.mxu1 %v130_v19 }
  0x12   :  { %174 = vmatpush.msra.mxu2 %v127_v1  ;;  %v119_v3 = vld [vmem:[#allocation2 + $0x190] sm:$0xff]  ;;  %v129_v20 = vld [vmem:[#allocation2 + $0x1e0] sm:$0xff]  ;;  %v132_v23 = vld [vmem:[#allocation2 + $0x1f8] sm:$0xff] }
  0x13   :  { %v115_v4 = vld [vmem:[#allocation2 + $0x170] sm:$0xff]  ;;  %v125_v22 = vld [vmem:[#allocation2 + $0x1c0] sm:$0xff]  ;;  %v254_v24 = vld [vmem:[#allocation4 + $0x148] sm:$0xff]  ;;  %133 = vmatpush.msra.mxu0 %v129_v20  ;;  %154 = vmatpush.msra.mxu1 %v126_v21 }
  0x14   :  { %175 = vmatpush.msra.mxu2 %v123_v2  ;;  %v111_v5 = vld [vmem:[#allocation2 + $0x150] sm:$0xff]  ;;  %v122_v25 = vld [vmem:[#allocation2 + $0x1a8] sm:$0xff]  ;;  %v121_v26 = vld [vmem:[#allocation2 + $0x1a0] sm:$0xff]  ;;  %193 = vmatpush.msra.mxu3 %v132_v23 }
  0x15   :  { %v107_v6 = vld [vmem:[#allocation2 + $0x130] sm:$0xff]  ;;  %v128_v27 = vld [vmem:[#allocation2 + $0x1d8] sm:$0xff]  ;;  %134 = vmatpush.msra.mxu0 %v125_v22  ;;  %v118_v29 = vld [vmem:[#allocation2 + $0x188] sm:$0xff]  ;;  %155 = vmatpush.msra.mxu1 %v122_v25 }
  0x16   :  { %176 = vmatpush.msra.mxu2 %v119_v3  ;;  %v103_v7 = vld [vmem:[#allocation2 + $0x110] sm:$0xff]  ;;  %v117_v30 = vld [vmem:[#allocation2 + $0x180] sm:$0xff]  ;;  %v124_v31 = vld [vmem:[#allocation2 + $0x1b8] sm:$0xff]  ;;  %194 = vmatpush.msra.mxu3 %v128_v27 }
  0x17   :  { %v99_v8 = vld [vmem:[#allocation2 + $0xf0] sm:$0xff]  ;;  %v248_v32 = vld [vmem:[#allocation4 + $0x118] sm:$0xff]  ;;  %135 = vmatpush.msra.mxu0 %v121_v26  ;;  %v114_v33 = vld [vmem:[#allocation2 + $0x168] sm:$0xff]  ;;  %156 = vmatpush.msra.mxu1 %v118_v29 }
  0x18   :  { %177 = vmatpush.msra.mxu2 %v115_v4  ;;  %v95_v9 = vld [vmem:[#allocation2 + $0xd0] sm:$0xff]  ;;  %v113_v34 = vld [vmem:[#allocation2 + $0x160] sm:$0xff]  ;;  %v120_v35 = vld [vmem:[#allocation2 + $0x198] sm:$0xff]  ;;  %195 = vmatpush.msra.mxu3 %v124_v31 }
  0x19   :  { %v91_v10 = vld [vmem:[#allocation2 + $0xb0] sm:$0xff]  ;;  %v245_v36 = vld [vmem:[#allocation4 + $0x100] sm:$0xff]  ;;  %136 = vmatpush.msra.mxu0 %v117_v30  ;;  %v110_v37 = vld [vmem:[#allocation2 + $0x148] sm:$0xff]  ;;  %157 = vmatpush.msra.mxu1 %v114_v33 }
  0x1a   :  { %178 = vmatpush.msra.mxu2 %v111_v5  ;;  %v87_v11 = vld [vmem:[#allocation2 + $0x90] sm:$0xff]  ;;  %v109_v38 = vld [vmem:[#allocation2 + $0x140] sm:$0xff]  ;;  %v116_v39 = vld [vmem:[#allocation2 + $0x178] sm:$0xff]  ;;  %196 = vmatpush.msra.mxu3 %v120_v35 }
  0x1b   :  { %v83_v12 = vld [vmem:[#allocation2 + $0x70] sm:$0xff]  ;;  %v242_v40 = vld [vmem:[#allocation4 + $0xe8] sm:$0xff]  ;;  %137 = vmatpush.msra.mxu0 %v113_v34  ;;  %158 = vmatpush.msra.mxu1 %v110_v37  ;;  %v105_v42 = vld [vmem:[#allocation2 + $0x120] sm:$0xff] }
  0x1c   :  { %179 = vmatpush.msra.mxu2 %v107_v6  ;;  %v79_v13 = vld [vmem:[#allocation2 + $0x50] sm:$0xff]  ;;  %v106_v41 = vld [vmem:[#allocation2 + $0x128] sm:$0xff]  ;;  %v112_v43 = vld [vmem:[#allocation2 + $0x158] sm:$0xff]  ;;  %197 = vmatpush.msra.mxu3 %v116_v39 }
  0x1d   :  { %v75_v14 = vld [vmem:[#allocation2 + $0x30] sm:$0xff]  ;;  %138 = vmatpush.msra.mxu0 %v109_v38  ;;  %v102_v45 = vld [vmem:[#allocation2 + $0x108] sm:$0xff]  ;;  %159 = vmatpush.msra.mxu1 %v106_v41  ;;  %v101_v46 = vld [vmem:[#allocation2 + $0x100] sm:$0xff] }
  0x1e   :  { %180 = vmatpush.msra.mxu2 %v103_v7  ;;  %v71_v15 = vld [vmem:[#allocation2 + $0x10] sm:$0xff]  ;;  %v108_v47 = vld [vmem:[#allocation2 + $0x138] sm:$0xff]  ;;  %198 = vmatpush.msra.mxu3 %v112_v43  ;;  %v98_v49 = vld [vmem:[#allocation2 + $0xe8] sm:$0xff] }
  0x1f   :  { %v251_v28 = vld [vmem:[#allocation4 + $0x130] sm:$0xff]  ;;  %v236_v48 = vld [vmem:[#allocation4 + $0xb8] sm:$0xff]  ;;  %139 = vmatpush.msra.mxu0 %v105_v42  ;;  %160 = vmatpush.msra.mxu1 %v102_v45  ;;  %v97_v50 = vld [vmem:[#allocation2 + $0xe0] sm:$0xff] }
  0x20   :  { %181 = vmatpush.msra.mxu2 %v99_v8  ;;  %v239_v44 = vld [vmem:[#allocation4 + $0xd0] sm:$0xff]  ;;  %v104_v51 = vld [vmem:[#allocation2 + $0x118] sm:$0xff]  ;;  %v233_v52 = vld [vmem:[#allocation4 + $0xa0] sm:$0xff]  ;;  %199 = vmatpush.msra.mxu3 %v108_v47 }
  0x21   :  { %140 = vmatpush.msra.mxu0 %v101_v46  ;;  %v94_v53 = vld [vmem:[#allocation2 + $0xc8] sm:$0xff]  ;;  %161 = vmatpush.msra.mxu1 %v98_v49  ;;  %v93_v54 = vld [vmem:[#allocation2 + $0xc0] sm:$0xff]  ;;  %v100_v55 = vld [vmem:[#allocation2 + $0xf8] sm:$0xff] }
  0x22   :  { %182 = vmatpush.msra.mxu2 %v95_v9  ;;  %v230_v56 = vld [vmem:[#allocation4 + $0x88] sm:$0xff]  ;;  %200 = vmatpush.msra.mxu3 %v104_v51  ;;  %v89_v58 = vld [vmem:[#allocation2 + $0xa0] sm:$0xff]  ;;  %v96_v59 = vld [vmem:[#allocation2 + $0xd8] sm:$0xff] }
  0x23   :  { %141 = vmatpush.msra.mxu0 %v97_v50  ;;  %v90_v57 = vld [vmem:[#allocation2 + $0xa8] sm:$0xff]  ;;  %162 = vmatpush.msra.mxu1 %v94_v53  ;;  %v227_v60 = vld [vmem:[#allocation4 + $0x70] sm:$0xff]  ;;  %v85_v62 = vld [vmem:[#allocation2 + $0x80] sm:$0xff] }
  0x24   :  { %183 = vmatpush.msra.mxu2 %v91_v10  ;;  %201 = vmatpush.msra.mxu3 %v100_v55  ;;  %v86_v61 = vld [vmem:[#allocation2 + $0x88] sm:$0xff]  ;;  %v92_v63 = vld [vmem:[#allocation2 + $0xb8] sm:$0xff]  ;;  %v81_v2 = vld [vmem:[#allocation2 + $0x60] sm:$0xff] }
  0x25   :  { %142 = vmatpush.msra.mxu0 %v93_v54  ;;  %163 = vmatpush.msra.mxu1 %v90_v57  ;;  %v224_v0 = vld [vmem:[#allocation4 + $0x58] sm:$0xff]  ;;  %v82_v1 = vld [vmem:[#allocation2 + $0x68] sm:$0xff]  ;;  %v221_v4 = vld [vmem:[#allocation4 + $0x40] sm:$0xff] }
  0x26   :  { %184 = vmatpush.msra.mxu2 %v87_v11  ;;  %202 = vmatpush.msra.mxu3 %v96_v59  ;;  %v88_v3 = vld [vmem:[#allocation2 + $0x98] sm:$0xff]  ;;  %v78_v5 = vld [vmem:[#allocation2 + $0x48] sm:$0xff]  ;;  %v77_v6 = vld [vmem:[#allocation2 + $0x40] sm:$0xff] }
  0x27   :  { %143 = vmatpush.msra.mxu0 %v89_v58  ;;  %164 = vmatpush.msra.mxu1 %v86_v61  ;;  %v84_v7 = vld [vmem:[#allocation2 + $0x78] sm:$0xff]  ;;  %v218_v8 = vld [vmem:[#allocation4 + $0x28] sm:$0xff]  ;;  %v73_v10 = vld [vmem:[#allocation2 + $0x20] sm:$0xff] }
  0x28   :  { %185 = vmatpush.msra.mxu2 %v83_v12  ;;  %203 = vmatpush.msra.mxu3 %v92_v63  ;;  %v74_v9 = vld [vmem:[#allocation2 + $0x28] sm:$0xff]  ;;  %v80_v11 = vld [vmem:[#allocation2 + $0x58] sm:$0xff]  ;;  %v215_v12 = vld [vmem:[#allocation4 + $0x10] sm:$0xff] }
  0x29   :  { %144 = vmatpush.msra.mxu0 %v85_v62  ;;  %165 = vmatpush.msra.mxu1 %v82_v1  ;;  %v258_v19 = vld [vmem:[#allocation4 + $0x168] sm:$0xff]  ;;  %v256_v20 = vld [vmem:[#allocation4 + $0x158] sm:$0xff]  ;;  %v255_v22 = vld [vmem:[#allocation4 + $0x150] sm:$0xff] }
  0x2a   :  { %186 = vmatpush.msra.mxu2 %v79_v13  ;;  %204 = vmatpush.msra.mxu3 %v88_v3  ;;  %v70_v13 = vld [vmem:[#allocation2 + $0x8] sm:$0xff]  ;;  %v72_v21 = vld [vmem:[#allocation2 + $0x18] sm:$0xff]  ;;  %v253_v23 = vld [vmem:[#allocation4 + $0x140] sm:$0xff] }
  0x2b   :  { %145 = vmatpush.msra.mxu0 %v81_v2  ;;  %166 = vmatpush.msra.mxu1 %v78_v5  ;;  %v252_v25 = vld [vmem:[#allocation4 + $0x138] sm:$0xff]  ;;  %v250_v26 = vld [vmem:[#allocation4 + $0x128] sm:$0xff]  ;;  %v342_v27 = vld [vmem:[#allocation6 + $0x70] sm:$0xff] }
  0x2c   :  { %187 = vmatpush.msra.mxu2 %v75_v14  ;;  %205 = vmatpush.msra.mxu3 %v84_v7  ;;  %v527_v14 = vld [vmem:[%s540_s0] sm:$0xff]  ;;  %v247_v29 = vld [vmem:[#allocation4 + $0x110] sm:$0xff]  ;;  %v341_v30 = vld [vmem:[#allocation6 + $0x68] sm:$0xff] }
  0x2d   :  { %146 = vmatpush.msra.mxu0 %v77_v6  ;;  %167 = vmatpush.msra.mxu1 %v74_v9  ;;  %v246_v31 = vld [vmem:[#allocation4 + $0x108] sm:$0xff]  ;;  %v340_v33 = vld [vmem:[#allocation6 + $0x60] sm:$0xff]  ;;  %v243_v34 = vld [vmem:[#allocation4 + $0xf0] sm:$0xff] }
  0x2e   :  { %188 = vmatpush.msra.mxu2 %v71_v15  ;;  %v259_v15 = vld [vmem:[#allocation4 + $0x170] sm:$0xff]  ;;  %206 = vmatpush.msra.mxu3 %v80_v11  ;;  %v241_v35 = vld [vmem:[#allocation4 + $0xe0] sm:$0xff]  ;;  %v240_v37 = vld [vmem:[#allocation4 + $0xd8] sm:$0xff] }
  0x2f   :  { %189 = vmatmul.f32.vlgmr.msra.gmra.mxu2 %v521_v18  ;;  %147 = vmatpush.msra.mxu0 %v73_v10  ;;  %v238_v38 = vld [vmem:[#allocation4 + $0xc8] sm:$0xff]  ;;  %v338_v39 = vld [vmem:[#allocation6 + $0x50] sm:$0xff]  ;;  %v336_v45 = vld [vmem:[#allocation6 + $0x40] sm:$0xff] }
  0x30   :  { %301 = vmatpush.msrb.mxu2 %v260_v16  ;;  %v69_v16 = vld [vmem:[#allocation2] sm:$0xff]  ;;  %168 = vmatpush.msra.mxu1 %v70_v13  ;;  %v235_v41 = vld [vmem:[#allocation4 + $0xb0] sm:$0xff]  ;;  %v337_v42 = vld [vmem:[#allocation6 + $0x48] sm:$0xff] }
  0x31   :  { %148 = vmatpush.msra.mxu0 %v69_v16  ;;  %169 = vmatmul.f32.vlgmr.msra.gmra.mxu1 %v521_v18  ;;  %v234_v43 = vld [vmem:[#allocation4 + $0xa8] sm:$0xff]  ;;  %v231_v46 = vld [vmem:[#allocation4 + $0x90] sm:$0xff]  ;;  %v229_v47 = vld [vmem:[#allocation4 + $0x80] sm:$0xff] }
  0x32   :  { %302 = vmatpush.msrb.mxu2 %v257_v17  ;;  %v76_v17 = vld [vmem:[#allocation2 + $0x38] sm:$0xff]  ;;  %281 = vmatpush.msrb.mxu1 %v259_v15  ;;  %v226_v50 = vld [vmem:[#allocation4 + $0x68] sm:$0xff]  ;;  %v225_v51 = vld [vmem:[#allocation4 + $0x60] sm:$0xff] }
  0x33   :  { %207 = vmatpush.msra.mxu3 %v76_v17  ;;  %261 = vmatpush.msrb.mxu0 %v258_v19  ;;  %v228_v49 = vld [vmem:[#allocation4 + $0x78] sm:$0xff]  ;;  %v333_v53 = vld [vmem:[#allocation6 + $0x28] sm:$0xff]  ;;  %v219_v57 = vld [vmem:[#allocation4 + $0x30] sm:$0xff] }
  0x34   :  { %303 = vmatpush.msrb.mxu2 %v254_v24  ;;  %282 = vmatpush.msrb.mxu1 %v256_v20  ;;  %v343_v24 = vld [vmem:[#allocation6 + $0x78] sm:$0xff]  ;;  %v222_v54 = vld [vmem:[#allocation4 + $0x48] sm:$0xff]  ;;  %v217_v58 = vld [vmem:[#allocation4 + $0x20] sm:$0xff] }
  0x35   :  { %208 = vmatpush.msra.mxu3 %v72_v21  ;;  %262 = vmatpush.msrb.mxu0 %v255_v22  ;;  %v220_v55 = vld [vmem:[#allocation4 + $0x38] sm:$0xff]  ;;  %v214_v61 = vld [vmem:[#allocation4 + $0x8] sm:$0xff]  ;;  %v330_v62 = vld [vmem:[#allocation6 + $0x10] sm:$0xff] }
  0x36   :  { %304 = vmatpush.msrb.mxu2 %v251_v28  ;;  %283 = vmatpush.msrb.mxu1 %v253_v23  ;;  %v249_v28 = vld [vmem:[#allocation4 + $0x120] sm:$0xff]  ;;  %v331_v59 = vld [vmem:[#allocation6 + $0x18] sm:$0xff] }
  0x37   :  { %344 = vmatpush.msrb.mxu3 %v343_v24  ;;  %149 = vmatmul.f32.vlgmr.msra.gmra.mxu0 %v521_v18  ;;  %v213_v63 = vld [vmem:[#allocation4] sm:$0xff] }
  0x38   :  { %305 = vmatpush.msrb.mxu2 %v248_v32  ;;  %263 = vmatpush.msrb.mxu0 %v252_v25  ;;  %v244_v32 = vld [vmem:[#allocation4 + $0xf8] sm:$0xff]  ;;  %v328_v1 = vld [vmem:[#allocation6] sm:$0xff] }
  0x39   :  { %284 = vmatpush.msrb.mxu1 %v250_v26  ;;  %345 = vmatpush.msrb.mxu3 %v342_v27 }
  0x3a   :  { %306 = vmatpush.msrb.mxu2 %v245_v36  ;;  %264 = vmatpush.msrb.mxu0 %v249_v28  ;;  %v339_v36 = vld [vmem:[#allocation6 + $0x58] sm:$0xff] }
  0x3b   :  { %285 = vmatpush.msrb.mxu1 %v247_v29  ;;  %346 = vmatpush.msrb.mxu3 %v341_v30 }
  0x3c   :  { %307 = vmatpush.msrb.mxu2 %v242_v40  ;;  %265 = vmatpush.msrb.mxu0 %v246_v31  ;;  %v237_v40 = vld [vmem:[#allocation4 + $0xc0] sm:$0xff] }
  0x3d   :  { %286 = vmatpush.msrb.mxu1 %v244_v32  ;;  %347 = vmatpush.msrb.mxu3 %v340_v33 }
  0x3e   :  { %308 = vmatpush.msrb.mxu2 %v239_v44  ;;  %266 = vmatpush.msrb.mxu0 %v243_v34  ;;  %v232_v44 = vld [vmem:[#allocation4 + $0x98] sm:$0xff] }
  0x3f   :  { %287 = vmatpush.msrb.mxu1 %v241_v35  ;;  %348 = vmatpush.msrb.mxu3 %v339_v36 }
  0x40   :  { %309 = vmatpush.msrb.mxu2 %v236_v48  ;;  %267 = vmatpush.msrb.mxu0 %v240_v37  ;;  %v335_v48 = vld [vmem:[#allocation6 + $0x38] sm:$0xff] }
  0x41   :  { %288 = vmatpush.msrb.mxu1 %v238_v38  ;;  %349 = vmatpush.msrb.mxu3 %v338_v39 }
  0x42   :  { %310 = vmatpush.msrb.mxu2 %v233_v52  ;;  %209 = vmatmul.f32.vlgmr.msra.gmra.mxu3 %v521_v18  ;;  %v334_v18 = vld [vmem:[#allocation6 + $0x30] sm:$0xff] }
  0x43   :  { %268 = vmatpush.msrb.mxu0 %v237_v40  ;;  %289 = vmatpush.msrb.mxu1 %v235_v41  ;;  %v223_v52 = vld [vmem:[#allocation4 + $0x50] sm:$0xff] }
  0x44   :  { %311 = vmatpush.msrb.mxu2 %v230_v56  ;;  %350 = vmatpush.msrb.mxu3 %v337_v42  ;;  %v332_v56 = vld [vmem:[#allocation6 + $0x20] sm:$0xff] }
  0x45   :  { %269 = vmatpush.msrb.mxu0 %v234_v43  ;;  %290 = vmatpush.msrb.mxu1 %v232_v44 }
  0x46   :  { %312 = vmatpush.msrb.mxu2 %v227_v60  ;;  %351 = vmatpush.msrb.mxu3 %v336_v45  ;;  %v216_v60 = vld [vmem:[#allocation4 + $0x18] sm:$0xff] }
  0x47   :  { %270 = vmatpush.msrb.mxu0 %v231_v46  ;;  %291 = vmatpush.msrb.mxu1 %v229_v47 }
  0x48   :  { %313 = vmatpush.msrb.mxu2 %v224_v0  ;;  %352 = vmatpush.msrb.mxu3 %v335_v48  ;;  %v329_v0 = vld [vmem:[#allocation6 + $0x8] sm:$0xff] }
  0x49   :  { %271 = vmatpush.msrb.mxu0 %v228_v49  ;;  %292 = vmatpush.msrb.mxu1 %v226_v50 }
  0x4a   :  { %314 = vmatpush.msrb.mxu2 %v221_v4  ;;  %353 = vmatpush.msrb.mxu3 %v334_v18 }
  0x4b   :  { %272 = vmatpush.msrb.mxu0 %v225_v51  ;;  %293 = vmatpush.msrb.mxu1 %v223_v52 }
  0x4c   :  { %315 = vmatpush.msrb.mxu2 %v218_v8  ;;  %354 = vmatpush.msrb.mxu3 %v333_v53 }
  0x4d   :  { %273 = vmatpush.msrb.mxu0 %v222_v54  ;;  %294 = vmatpush.msrb.mxu1 %v220_v55 }
  0x4e   :  { %316 = vmatpush.msrb.mxu2 %v215_v12  ;;  %355 = vmatpush.msrb.mxu3 %v332_v56 }
  0x4f   :  { %317 = vmatmul.f32.vlgmr.msrb.gmra.mxu2 %v527_v14  ;;  %274 = vmatpush.msrb.mxu0 %v219_v57 }
  0x50   :  { %295 = vmatpush.msrb.mxu1 %v217_v58  ;;  %356 = vmatpush.msrb.mxu3 %v331_v59 }
  0x51   :  { %275 = vmatpush.msrb.mxu0 %v216_v60 }
  0x52   :  { %296 = vmatpush.msrb.mxu1 %v214_v61  ;;  %357 = vmatpush.msrb.mxu3 %v330_v62 }
  0x53   :  { %297 = vmatmul.f32.vlgmr.msrb.gmra.mxu1 %v527_v14  ;;  %276 = vmatpush.msrb.mxu0 %v213_v63 }
  0x54   :  { %358 = vmatpush.msrb.mxu3 %v329_v0  ;;  %277 = vmatmul.f32.vlgmr.msrb.gmra.mxu0 %v527_v14 }
  0x56   :  { %359 = vmatpush.msrb.mxu3 %v328_v1 }
  0xae   :  { %v170_v7 = vpop.f32.mrf.mxu1 }
  0xb2   :  { %v190_v2 = vpop.f32.mrf.mxu2 }
  0xb4   :  { %v150_v8 = vpop.f32.mrf.mxu0 }
  0xc5   :  { %v210_v9 = vpop.f32.mrf.mxu3 }
  0xd0   :  { %v298_v10 = vpop.f32.mrf.mxu1 }
  0xd1   :  { %v278_v11 = vpop.f32.mrf.mxu0  ;;  %v323_v12 = vadd.f32 %v298_v10, %v170_v7 }
  0xd2   :  { %v318_v3 = vpop.f32.mrf.mxu2  ;;  %v321_v13 = vadd.f32 %v278_v11, %v150_v8 }
  0xd3   :  { %v325_v4 = vadd.f32 %v318_v3, %v190_v2 }
  0xd5   :  { %386 = vtanh.f32 %v325_v4 }
  0xd6   :  { %388 = vtanh.f32 %v323_v12 }
  0xd7   :  { %390 = vtanh.f32 %v321_v13 }
  0xdb   :  { %v387_v5 = vpop.eup %386 }
  0xdc   :  { %v327_v6 = vmul.f32 %v387_v5, %v527_v14  ;;  %v389_v17 = vpop.eup %388 }
  0xdd   :  { %v391_v19 = vpop.eup %390  ;;  %v366_v20 = vsub.f32 1.0, %v389_v17 }
  0xde   :  { %360 = vmatmul.f32.vlgmr.msrb.gmra.mxu3 %v327_v6  ;;  %v368_v22 = vmul.f32 %v391_v19, %v527_v14 }
 0x161   :  { %v361_v15 = vpop.f32.mrf.mxu3 }
 0x162   :  { %v364_v16 = vadd.f32 %v361_v15, %v210_v9 }
 0x164   :  { %392 = vtanh.f32 %v364_v16 }
 0x16a   :  { %v393_v21 = vpop.eup %392 }
 0x16b   :  { %v367_v23 = vmul.f32 %v393_v21, %v366_v20 }
 0x16d   :  { %v369_v24 = vadd.f32 %v368_v22, %v367_v23 }
 0x16f   :  { %370 = vst [vmem:[%s545_s5] sm:$0xff] %v369_v24 }
 0x170   :  { %375 = vsyncpa [#allocation3], 1 }
 0x171   :  { %376 = vsyncpa [#allocation5], 1 }

</bundles_post_ra>
